<compile_context>
chip_gen: v6e
topology: v6e:2x2x1
jax: 0.10.0
libtpu: 0.0.40
codegen_flags: <defaults>
</compile_context>

<pallas_src>
import functools

import jax
import jax.numpy as jnp
from jax.experimental import pallas as pl
from jax.experimental.pallas import tpu as pltpu

LANE = 128


def _round_up(v, m):
    return ((v + m - 1) // m) * m


def _classifier_kernel(x_ref, w1_ref, b1_ref, w2_ref, b2_ref, o_ref):
    # x arrives f32; cast to bf16 in-register (VPU op hidden under the MXU)
    # instead of a separate wrapper-side cast pass over HBM.
    x = x_ref[...].astype(w1_ref.dtype)
    # Linear 1: bf16 operands, f32 MXU accumulation.
    h = jnp.dot(x, w1_ref[...], preferred_element_type=jnp.float32)
    # Bias + ReLU in f32 on the VPU (keep epilogue f32: v5e has no bf16 VPU).
    h = jnp.maximum(h + b1_ref[...], 0.0)
    # Linear 2: bf16 activations for the MXU, f32 accumulation, bias add,
    # lane-dense (tm, 128) f32 store.
    y = jnp.dot(h.astype(w2_ref.dtype), w2_ref[...],
                preferred_element_type=jnp.float32)
    o_ref[...] = (y + b2_ref[...]).astype(o_ref.dtype)


def prepare_classifier_params(w1, b1, w2, b2):
    """One-time weight preparation (hoisted out of the per-call path).

    Zero-pads the class dimension to a 128-lane-dense tile, casts matmul
    weights to bf16, and reshapes biases into (1, H) / (1, C_pad) rows.
    """
    d, h = w1.shape
    h2, c = w2.shape
    assert h2 == h
    c_pad = max(LANE, _round_up(c, LANE))
    w2_pad = jnp.zeros((h, c_pad), jnp.bfloat16).at[:, :c].set(
        w2.astype(jnp.bfloat16))
    b2_pad = jnp.zeros((1, c_pad), jnp.float32).at[:, :c].set(
        b2.reshape(1, c).astype(jnp.float32))
    return dict(
        w1=w1.astype(jnp.bfloat16),
        b1=b1.reshape(1, h).astype(jnp.float32),
        w2=w2_pad,
        b2=b2_pad,
    )


def _pick_tile_m(n):
    # bf16 native sublane tile is (16, 128): keep tm a multiple of 16.
    if n <= 128:
        return _round_up(max(n, 16), 16)          # single block
    if n <= 512:
        return 128                                # 2..4 grid steps
    # Large batches: aim for >=4 grid steps (>=2 per TensorCore on v7x) while
    # keeping tiles up to 512 rows to amortize ~0.35us/step on v5e/v6e.
    return min(512, max(128, ((n // 4) // LANE) * LANE))


@functools.partial(jax.jit,
                   static_argnames=("num_classes", "tile_m", "slice_logits"))
def classifier_forward(x, w1, b1, w2, b2, *, num_classes,
                       tile_m=None, slice_logits=True):
    """x: (N, D) f32; w1/b1/w2/b2 from prepare_classifier_params().

    Returns (N, num_classes) f32 logits, or the lane-padded (N, 128) slab
    when slice_logits=False (lets a downstream consumer slice/fuse lazily).
    """
    n, d = x.shape
    hdim = w1.shape[1]
    c_pad = w2.shape[1]

    tm = _pick_tile_m(n) if tile_m is None else _round_up(tile_m, 16)
    grid = (pl.cdiv(n, tm),)   # ragged last block handled by Pallas masking

    # Scheduling hint for XLA around the custom call.
    flops = 2 * n * d * hdim + 2 * n * hdim * c_pad
    bytes_accessed = (x.size * 4 + w1.size * 2 + w2.size * 2
                      + b1.size * 4 + b2.size * 4 + n * c_pad * 4)

    # VMEM budget: double-buffered x/out tiles + resident weights (counted
    # double-buffered as worst case), with headroom. Fits v7x's 64 MiB even
    # at the module's default 3072x2048 sizes.
    # NOTE: constant-index weight specs could use pipeline_mode=pl.Buffered(1)
    # to drop their second buffer; immaterial (<~1 MiB) at these sizes.
    # TODO(synk): if input_dim/hidden_dim grow into the multi-thousands,
    # switch w1/w2 to a K-tiled grid with a pl.when-initialized VMEM f32
    # accumulator instead of fully-resident weights (v7x VMEM is 64 MiB).
    vmem_est = (2 * (tm * d * 4 + tm * c_pad * 4)
                + 2 * (w1.size * 2 + w2.size * 2 + b1.size * 4 + b2.size * 4))
    vmem_limit = int(min(100 * 2**20, max(32 * 2**20, 2 * vmem_est)))

    out = pl.pallas_call(
        _classifier_kernel,
        out_shape=jax.ShapeDtypeStruct((n, c_pad), jnp.float32),
        grid_spec=pltpu.PrefetchScalarGridSpec(
            num_scalar_prefetch=0,
            grid=grid,
            in_specs=[
                pl.BlockSpec((tm, d), lambda i: (i, 0)),        # x rows: tiled
                pl.BlockSpec((d, hdim), lambda i: (0, 0)),      # w1: resident
                pl.BlockSpec((1, hdim), lambda i: (0, 0)),      # b1: resident
                pl.BlockSpec((hdim, c_pad), lambda i: (0, 0)),  # w2: resident
                pl.BlockSpec((1, c_pad), lambda i: (0, 0)),     # b2: resident
            ],
            out_specs=pl.BlockSpec((tm, c_pad), lambda i: (i, 0)),
        ),
        compiler_params=pltpu.CompilerParams(
            dimension_semantics=("parallel",),    # megacore / 2-TC sharding
            vmem_limit_bytes=vmem_limit,
        ),
        cost_estimate=pl.CostEstimate(
            flops=flops, transcendentals=0, bytes_accessed=bytes_accessed),
    )(x, w1, b1, w2, b2)

    if slice_logits:
        return out[:, :num_classes]
    return out


def _reference_forward_f32(x, w1, b1, w2, b2):
    h = jnp.maximum(x @ w1 + b1, 0.0)
    return h @ w2 + b2


def _reference_forward_bf16(x, w1, b1, w2, b2):
    # Mirrors the kernel's numerics: bf16 matmul operands, f32 accumulation,
    # f32 bias + ReLU epilogue.
    h = jnp.dot(x.astype(jnp.bfloat16), w1.astype(jnp.bfloat16),
                preferred_element_type=jnp.float32) + b1
    h = jnp.maximum(h, 0.0)
    y = jnp.dot(h.astype(jnp.bfloat16), w2.astype(jnp.bfloat16),
                preferred_element_type=jnp.float32)
    return y + b2


if __name__ == "__main__":
    # Small, shape-consistent instantiation of the module:
    #   Classifier(input_dim=256, hidden_dim=128, num_classes=10), batch=512
    # (batch large enough for 4 grid steps -> exercises tiling / pipelining).
    batch, input_dim, hidden_dim, num_classes = 512, 256, 128, 10

    key = jax.random.PRNGKey(0)
    kx, kw1, kb1, kw2, kb2 = jax.random.split(key, 5)

    x = jax.random.normal(kx, (batch, input_dim), dtype=jnp.float32)

    # nn.Linear-style U(-1/sqrt(fan_in), 1/sqrt(fan_in)) init.
    lim1 = 1.0 / (input_dim ** 0.5)
    lim2 = 1.0 / (hidden_dim ** 0.5)
    w1 = jax.random.uniform(kw1, (input_dim, hidden_dim),
                            minval=-lim1, maxval=lim1, dtype=jnp.float32)
    b1 = jax.random.uniform(kb1, (hidden_dim,),
                            minval=-lim1, maxval=lim1, dtype=jnp.float32)
    w2 = jax.random.uniform(kw2, (hidden_dim, num_classes),
                            minval=-lim2, maxval=lim2, dtype=jnp.float32)
    b2 = jax.random.uniform(kb2, (num_classes,),
                            minval=-lim2, maxval=lim2, dtype=jnp.float32)

    # One-time weight prep, hoisted out of the per-call path.
    params = jax.block_until_ready(prepare_classifier_params(w1, b1, w2, b2))

    out = classifier_forward(x, params["w1"], params["b1"],
                             params["w2"], params["b2"],
                             num_classes=num_classes)
    out = jax.block_until_ready(out)
    assert out.shape == (batch, num_classes)

    # Tight check vs a reference with matching (bf16-operand) numerics.
    ref_bf16 = _reference_forward_bf16(x, w1, b1, w2, b2)
    assert jnp.allclose(out, ref_bf16, atol=2e-3, rtol=2e-3), \
        "mismatch vs bf16-matched reference"

    # Loose sanity check vs the pure f32 module semantics (bf16 rounding only).
    ref_f32 = _reference_forward_f32(x, w1, b1, w2, b2)
    assert jnp.allclose(out, ref_f32, atol=5e-2, rtol=5e-2), \
        "mismatch vs f32 reference"

    # Ragged batch: exercises grid = pl.cdiv(n, tm) with a masked last block.
    n_ragged = 200
    out_r = jax.block_until_ready(
        classifier_forward(x[:n_ragged], params["w1"], params["b1"],
                           params["w2"], params["b2"],
                           num_classes=num_classes))
    assert out_r.shape == (n_ragged, num_classes)
    assert jnp.allclose(out_r, ref_bf16[:n_ragged], atol=2e-3, rtol=2e-3), \
        "mismatch on ragged batch"

    print("KERNEL_OK")
</pallas_src>

<mosaic_0001>
module attributes {stable_mosaic.version = 11 : i64} {
  func.func @_classifier_kernel(%arg0: i32, %arg1: memref<128x256xf32, #tpu.memory_space<vmem>>, %arg2: memref<256x128xbf16, #tpu.memory_space<vmem>>, %arg3: memref<1x128xf32, #tpu.memory_space<vmem>>, %arg4: memref<128x128xbf16, #tpu.memory_space<vmem>>, %arg5: memref<1x128xf32, #tpu.memory_space<vmem>>, %arg6: memref<128x128xf32, #tpu.memory_space<vmem>>) attributes {dimension_semantics = [#tpu.dimension_semantics<parallel>], iteration_bounds = array<i64: 4>, scalar_prefetch = 0 : i64, scratch_operands = 0 : i64, tpu.core_type = #tpu.core_type<tc>, window_params = [{transform_indices = @transform_0, window_bounds = array<i64: 128, 256>}, {pipeline_mode = #tpu.pipeline_mode<synchronous>, transform_indices = @transform_1, window_bounds = array<i64: 256, 128>}, {pipeline_mode = #tpu.pipeline_mode<synchronous>, transform_indices = @transform_2, window_bounds = array<i64: 1, 128>}, {pipeline_mode = #tpu.pipeline_mode<synchronous>, transform_indices = @transform_3, window_bounds = array<i64: 128, 128>}, {pipeline_mode = #tpu.pipeline_mode<synchronous>, transform_indices = @transform_4, window_bounds = array<i64: 1, 128>}, {transform_indices = @transform_5, window_bounds = array<i64: 128, 128>}]} {
    %c0 = arith.constant 0 : index
    %c0_0 = arith.constant 0 : index
    %0 = vector.load %arg1[%c0, %c0_0] : memref<128x256xf32, #tpu.memory_space<vmem>>, vector<128x256xf32>
    %1 = arith.truncf %0 : vector<128x256xf32> to vector<128x256xbf16>
    %c0_1 = arith.constant 0 : index
    %c0_2 = arith.constant 0 : index
    %2 = vector.load %arg2[%c0_1, %c0_2] : memref<256x128xbf16, #tpu.memory_space<vmem>>, vector<256x128xbf16>
    %cst = arith.constant dense<0.000000e+00> : vector<128x128xf32>
    %3 = tpu.matmul %1, %2, %cst {dimension_numbers = #tpu.dot_dimension_numbers<[1], [0], [0], [1], [0, 0, 1, 1], [], []>} : vector<128x256xbf16>, vector<256x128xbf16>, vector<128x128xf32> -> vector<128x128xf32>
    %c0_3 = arith.constant 0 : index
    %c0_4 = arith.constant 0 : index
    %4 = vector.load %arg3[%c0_3, %c0_4] : memref<1x128xf32, #tpu.memory_space<vmem>>, vector<1x128xf32>
    %5 = vector.broadcast %4 : vector<1x128xf32> to vector<128x128xf32>
    %6 = arith.addf %3, %5 : vector<128x128xf32>
    %cst_5 = arith.constant 0.000000e+00 : f32
    %7 = vector.broadcast %cst_5 : f32 to vector<128x128xf32>
    %8 = arith.maximumf %6, %7 : vector<128x128xf32>
    %9 = arith.truncf %8 : vector<128x128xf32> to vector<128x128xbf16>
    %c0_6 = arith.constant 0 : index
    %c0_7 = arith.constant 0 : index
    %10 = vector.load %arg4[%c0_6, %c0_7] : memref<128x128xbf16, #tpu.memory_space<vmem>>, vector<128x128xbf16>
    %cst_8 = arith.constant dense<0.000000e+00> : vector<128x128xf32>
    %11 = tpu.matmul %9, %10, %cst_8 {dimension_numbers = #tpu.dot_dimension_numbers<[1], [0], [0], [1], [0, 0, 1, 1], [], []>} : vector<128x128xbf16>, vector<128x128xbf16>, vector<128x128xf32> -> vector<128x128xf32>
    %c0_9 = arith.constant 0 : index
    %c0_10 = arith.constant 0 : index
    %12 = vector.load %arg5[%c0_9, %c0_10] : memref<1x128xf32, #tpu.memory_space<vmem>>, vector<1x128xf32>
    %13 = vector.broadcast %12 : vector<1x128xf32> to vector<128x128xf32>
    %14 = arith.addf %11, %13 : vector<128x128xf32>
    %c0_11 = arith.constant 0 : index
    %c0_12 = arith.constant 0 : index
    %15 = vector.load %arg6[%c0_11, %c0_12] : memref<128x128xf32, #tpu.memory_space<vmem>>, vector<128x128xf32>
    tpu.vector_store %arg6[%c0_11, %c0_12], %14 {strides = array<i32>} : memref<128x128xf32, #tpu.memory_space<vmem>>, vector<128x128xf32>,
    return
  }
  func.func @transform_0(%arg0: i32) -> (i32, i32) {
    %c0_i32 = arith.constant 0 : i32
    %c0_i32_0 = arith.constant 0 : i32
    return %arg0, %c0_i32 : i32, i32
  }
  func.func @transform_1(%arg0: i32) -> (i32, i32) {
    %c0_i32 = arith.constant 0 : i32
    %c0_i32_0 = arith.constant 0 : i32
    %c0_i32_1 = arith.constant 0 : i32
    return %c0_i32, %c0_i32_0 : i32, i32
  }
  func.func @transform_2(%arg0: i32) -> (i32, i32) {
    %c0_i32 = arith.constant 0 : i32
    %c0_i32_0 = arith.constant 0 : i32
    %c0_i32_1 = arith.constant 0 : i32
    return %c0_i32, %c0_i32_0 : i32, i32
  }
  func.func @transform_3(%arg0: i32) -> (i32, i32) {
    %c0_i32 = arith.constant 0 : i32
    %c0_i32_0 = arith.constant 0 : i32
    %c0_i32_1 = arith.constant 0 : i32
    return %c0_i32, %c0_i32_0 : i32, i32
  }
  func.func @transform_4(%arg0: i32) -> (i32, i32) {
    %c0_i32 = arith.constant 0 : i32
    %c0_i32_0 = arith.constant 0 : i32
    %c0_i32_1 = arith.constant 0 : i32
    return %c0_i32, %c0_i32_0 : i32, i32
  }
  func.func @transform_5(%arg0: i32) -> (i32, i32) {
    %c0_i32 = arith.constant 0 : i32
    %c0_i32_0 = arith.constant 0 : i32
    return %arg0, %c0_i32 : i32, i32
  }
}

</mosaic_0001>

<bundles_post_ra>
// kernel: classifier_forward.1
= control target key start
LH: loop header
LB: loop body
LE: loop exit
PB: predicated region body
PF: predicated region fallthrough
CT: control target
= control target key end

     0   :  { %10 = vsyncpa [#allocation3], 0  ;;  %s1471_s0 = inlined_call_operand.hbm [shape: f32[512,256], index: 0, kind: input, shape index: {}]   ;;  %s1472_s1 = inlined_call_operand.hbm [shape: bf16[256,128], index: 1, kind: input, shape index: {}]   ;;  %s1473_s2 = inlined_call_operand.vmem [shape: f32[1,128], index: 2, kind: input, shape index: {}]   ;;  %s1474_s3 = inlined_call_operand.hbm [shape: bf16[128,128], index: 3, kind: input, shape index: {}]   ;;  %s1475_s4 = inlined_call_operand.vmem [shape: f32[1,128], index: 4, kind: input, shape index: {}]   ;;  %s1476_s5 = inlined_call_operand.vmem [shape: f32[512,128], index: 5, kind: output, shape index: {}]  }
   0x1   :  { %12 = vsyncpa [#allocation3 + $0x1], 0 }
   0x2   :  { %13 = vsyncpa [#allocation5], 0  ;;  %s1255_s18 = smov 0   ;;  %s1257_s19 = smov 0  }
   0x3   :  { %s1259_s20 = smov 0   ;;  %s1261_s21 = smov 0  }
   0x4 LB: > { %s852_s22 = sadd.s32 4294967295, %s1216_s21   ;;  %p39_p0 = scmp.ne.s32.totalorder %s1208_s19, %s1204_s18  ;;  %s1216_s21 = sphi %s1261_s21, %s1493_s21   ;;  %s1212_s20 = sphi %s1259_s20, %s1492_s20   ;;  %s1208_s19 = sphi %s1257_s19, %s1491_s19   ;;  %s1204_s18 = sphi %s1255_s18, %s1490_s18  }
   0x5   : > { %p1277_p1 = scmp.eq.s32.totalorder %s852_s22, 0  ;;  %p854_p2 = scmp.ge.s32.totalorder %s1216_s21, 1 }
   0x6   : > { %p160_p3 = scmp.lt.s32.totalorder %s1216_s21, 5  ;;  %s1218_s26 = smov [#allocation4]  }
   0x7   : > { %s1481_s23 = scalar_select %p1277_p1, 1, 0 }
   0x8   : > { %p1285_p4 = por %p1277_p1, %p39_p0  ;;  %p1289_p5 = pnand %p854_p2, %p160_p3 }
   0x9   : > { %s172_s27 = sshll.u32 %s1218_s26, 4  ;;  %s1219_s29 = smov [#allocation6]   ;;  %s173_s27 = int_to_ptr.vmem [resolvable:$true] %s172_s27 }
   0xa   : > { %s1482_s24 = scalar_select %p1285_p4, 1, 0 }
   0xb   : > { %s1483_s25 = scalar_select %p1289_p5, 1, 0 }
   0xc   : > { %p1020_p6 = pneg %p1289_p5  ;;  %s188_s30 = sshll.u32 %s1219_s29, 4  ;;  %s189_s30 = int_to_ptr.vmem [resolvable:$true] %s188_s30 }
   0xd   : > { %s1109_s6 = scalar_lea.vmem %s173_s27, 2048  ;;  %p1117_p12 = scmp.lt.s32.totalorder %s173_s27, %s173_s27 }
   0xe   : > { %p1297_p7 = pnand %p1020_p6, %p1277_p1  ;;  %p1110_p9 = scmp.ne.s32.totalorder %s173_s27, %s1109_s6 }
   0xf   : > { %p1118_p13 = scmp.lt.s32.totalorder %s1109_s6, %s1109_s6 }
  0x10   : > { %p1100_p8 = pneg %p1297_p7 }
  0x11   : > { %p1119_p0 = por %p1118_p13, %p1117_p12 }
  0x12   : > { %p1112_p10 = pnand %p1110_p9, %p1100_p8 }
  0x14   : > { %p1113_p11 = pneg %p1112_p10 }
  0x16   : > { %p1120_p2 = pnand %p1119_p0, %p1113_p11 }
  0x18   : > { %1123 = shalt.err (!%p1120_p2)
}
  0x19   : > { %s1220_s7 = smov 64   ;;  %s1221_s8 = smov 4  }
  0x1a   : > { %1023 = dma.hbm_to_vmem [thread:$0]  (!%p1297_p7), %s1472_s1, 2048, %s173_s27, [#allocation5], %s1220_s7, %s1220_s7, %s1221_s8  }
  0x1b   : > { %s1135_s11 = scalar_lea.vmem %s189_s30, 1024  ;;  %p1143_p10 = scmp.lt.s32.totalorder %s189_s30, %s189_s30 }
  0x1c   : > { %p1136_p3 = scmp.ne.s32.totalorder %s189_s30, %s1135_s11  ;;  %p1144_p1 = scmp.lt.s32.totalorder %s1135_s11, %s1135_s11 }
  0x1e   : > { %p1138_p6 = pnand %p1136_p3, %p1100_p8  ;;  %p1145_p12 = por %p1144_p1, %p1143_p10 }
  0x20   : > { %p1139_p9 = pneg %p1138_p6 }
  0x22   : > { %p1146_p11 = pnand %p1145_p12, %p1139_p9 }
  0x24   : > { %1149 = shalt.err (!%p1146_p11)
}
  0x25   : > { %1026 = dma.hbm_to_vmem [thread:$0]  (!%p1297_p7), %s1474_s3, 1024, %s189_s30, [#allocation5], %s1220_s7, %s1220_s7, %s1221_s8  }
  0x26   : > { %s1320_s14 = sadd.s32 1, %s1216_s21   ;;  %s26_s15 = sadd.s32 1, %s1212_s20 }
  0x27   : > { %s23_s16 = ssub.s32 %s1216_s21, %s1320_s14  ;;  %p33_p1 = scmp.ne.s32.totalorder %s1212_s20, %s1208_s19 }
  0x28   : > { %p24_p8 = scmp.eq.s32.totalorder %s23_s16, 0  ;;  %p34_p13 = scmp.eq.s32.totalorder %s1216_s21, 0 }
  0x29   : > { %p1033_p0 = scmp.lt.s32.totalorder %s1216_s21, 4  ;;  %s205_s17 = sand.u32 1, %s1212_s20  }
  0x2a   : > { %s1331_s18 = scalar_select %p24_p8, %s1212_s20, %s26_s15  }
  0x2b   : > { %p35_p2 = por %p34_p13, %p33_p1  ;;  %s858_s26 = sshll.u32 %s205_s17, 8 }
  0x2c   : > { %s897_s27 = sshll.u32 %s1216_s21, 12  ;;  %s209_s30 = scalar_lea.vmem [#allocation2], %s858_s26 }
  0x2d   : > { %s1337_s6 = scalar_lea.hbm %s1471_s0, %s897_s27  ;;  %s217_s7 = sshll.u32 %s209_s30, 4  ;;  %s1343_s7 = int_to_ptr.vmem [resolvable:$true] %s217_s7 }
  0x2e   : > { %p1339_p7 = pnand %p1033_p0, %p35_p2  ;;  %s1345_s9 = scalar_lea.sflag [#allocation3], %s205_s17 }
  0x2f   : > { %s1150_s10 = scalar_lea.hbm %s1337_s6, 4096  ;;  %s1155_s13 = scalar_lea.hbm %s1471_s0, 16384 }
  0x30   : > { %p1151_p3 = scmp.ne.s32.totalorder %s1337_s6, %s1150_s10  ;;  %p1152_p6 = pneg %p1339_p7 }
  0x31   : > { %p1156_p12 = scmp.lt.s32.totalorder %s1337_s6, %s1471_s0  ;;  %p1157_p11 = scmp.lt.s32.totalorder %s1155_s13, %s1150_s10 }
  0x32   : > { %p1153_p9 = pnand %p1152_p6, %p1151_p3 }
  0x33   : > { %p1158_p1 = por %p1157_p11, %p1156_p12 }
  0x34   : > { %p1154_p10 = pneg %p1153_p9 }
  0x36   : > { %p1159_p8 = pnand %p1158_p1, %p1154_p10 }
  0x38   : > { %1162 = shalt.err (!%p1159_p8)
}
  0x39   : > { %s1163_s17 = scalar_lea.vmem %s1343_s7, 4096  ;;  %s1222_s26 = smov [#allocation2]  }
  0x3a   : > { %p1164_p13 = scmp.ne.s32.totalorder %s1343_s7, %s1163_s17  ;;  %s1168_s27 = sshll.u32 %s1222_s26, 4  ;;  %s1169_s27 = int_to_ptr.vmem [resolvable:$false] %s1168_s27 }
  0x3b   : > { %s1170_s28 = scalar_lea.vmem %s1169_s27, 8192  ;;  %p1171_p3 = scmp.lt.s32.totalorder %s1343_s7, %s1169_s27 }
  0x3c   : > { %p1166_p0 = pnand %p1164_p13, %p1152_p6  ;;  %p1172_p9 = scmp.lt.s32.totalorder %s1170_s28, %s1163_s17 }
  0x3e   : > { %p1167_p2 = pneg %p1166_p0  ;;  %p1173_p4 = por %p1172_p9, %p1171_p3 }
  0x40   : > { %p1174_p5 = pnand %p1173_p4, %p1167_p2 }
  0x42   : > { %1177 = shalt.err (!%p1174_p5)
}
  0x43   : > { %s1223_s29 = smov 256   ;;  %s1224_s30 = smov 16  }
  0x44   : > { %1030 = dma.hbm_to_vmem [thread:$0]  (!%p1339_p7), %s1337_s6, 4096, %s1343_s7, %s1345_s9, %s1223_s29, %s1223_s29, %s1224_s30  }
  0x45   : > { %p1486_p6 = scmp.ne.s32.totalorder %s1483_s25, 0 }
  0x46   : > { %s231_s10 = sand.u32 (!%p1486_p6), 1, %s1208_s19   ;;  %p1487_p4 = scmp.ne.s32.totalorder (!%p1486_p6), %s1482_s24, 0 }
  0x47   : > { %229 = sbr.rel (%p1486_p6) target bundleno = 578 (0x242), region = 40  ;;  %s863_s11 = sshll.u32 (!%p1486_p6), %s231_s10, 8 }
  0x48   : > { %s232_s12 = scalar_lea.sflag (!%p1486_p6), [#allocation3], %s231_s10  ;;  %s1369_s13 = scalar_lea.vmem (!%p1486_p6), [#allocation2], %s863_s11 }
  0x4c   : > { %1195 = dma.done.wait (%p1487_p4), %s232_s12, 4096  }
  0x4d   : > { %1197 = vsyncadd (%p1487_p4), %s232_s12, 4294963200  ;;  %p1488_p5 = scmp.ne.s32.totalorder %s1481_s23, 0 }
  0x4f   : > { %1199 = dma.done.wait (%p1488_p5), [#allocation5], 3072  }
  0x50   : > { %1201 = vsyncadd (%p1488_p5), [#allocation5], 4294964224  ;;  %v1074_v0 = vld [vmem:[#allocation4 + $0x78] sm:$0xff]   ;;  %v1076_v2 = vld [vmem:[#allocation4 + $0x70] sm:$0xff]   ;;  %s866_s25 = sshll.u32 %s852_s22, 4 }
  0x51   : > { %v1075_v1 = vld [vmem:[#allocation4 + $0x38] sm:$0xff]   ;;  %898 = vmatprep.subr.bf16.mxu0 %v1074_v0  ;;  %v1077_v3 = vld [vmem:[#allocation4 + $0x30] sm:$0xff]   ;;  %v1078_v4 = vld [vmem:[#allocation4 + $0x68] sm:$0xff]   ;;  %p272_p7 = scmp.lt.s32.totalorder %s866_s25, 63 }
  0x52   : > { %899 = vmatpush3.bf16.msra.mxu0 %v1075_v1  ;;  %v1079_v5 = vld [vmem:[#allocation4 + $0x28] sm:$0xff]   ;;  %v1080_v6 = vld [vmem:[#allocation4 + $0x60] sm:$0xff]   ;;  %v1082_v8 = vld [vmem:[#allocation4 + $0x58] sm:$0xff]  }
  0x53   : > { %900 = vmatprep.subr.bf16.mxu0 %v1076_v2  ;;  %v1081_v7 = vld [vmem:[#allocation4 + $0x20] sm:$0xff]   ;;  %v1083_v9 = vld [vmem:[#allocation4 + $0x18] sm:$0xff]   ;;  %v1084_v10 = vld [vmem:[#allocation4 + $0x50] sm:$0xff]   ;;  %s1495_s25 = smov (!%p272_p7, %s866_s25), 63 }
  0x54   : > { %v279_v11 = vld [vmem:[%s1369_s13 + $0x8] sm:$0xff]  ;;  %v281_v12 = vld [vmem:[%s1369_s13 + $0x18] sm:$0xff]  ;;  %v1085_v14 = vld [vmem:[#allocation4 + $0x10] sm:$0xff]   ;;  %s867_s6 = sshll.u32 %s1495_s25, 3 }
  0x55   : > { %v311_v13 = vpack.c.bf16 %v281_v12, %v279_v11  ;;  %v1086_v15 = vld [vmem:[#allocation4 + $0x48] sm:$0xff]   ;;  %v1088_v17 = vld [vmem:[#allocation4 + $0x40] sm:$0xff]   ;;  %v280_v20 = vld [vmem:[%s1369_s13 + $0x10] sm:$0xff]  ;;  %s1440_s16 = scalar_lea.vmem %s1476_s5, %s867_s6 }
  0x56   : > { %901 = vmatpush3.bf16.msra.mxu0 %v1077_v3  ;;  %v1087_v16 = vld [vmem:[#allocation4 + $0x8] sm:$0xff]   ;;  %v1089_v18 = vld [vmem:[#allocation4] sm:$0xff]   ;;  %v285_v22 = vld [vmem:[%s1369_s13 + $0x38] sm:$0xff] }
  0x57   : > { %902 = vmatprep.subr.bf16.mxu0 %v1078_v4  ;;  %493 = vmatprep.mubr.bf16.mxu0 %v311_v13  ;;  %v278_v19 = vld [vmem:[%s1369_s13] sm:$0xff]  ;;  %v283_v21 = vld [vmem:[%s1369_s13 + $0x28] sm:$0xff]  ;;  %v1090_v23 = vld [vmem:[#allocation6 + $0x38] sm:$0xff]  }
  0x58   : > { %v1091_v24 = vld [vmem:[#allocation6 + $0x30] sm:$0xff]   ;;  %978 = vmatprep.subr.bf16.mxu1 %v1090_v23  ;;  %v1092_v25 = vld [vmem:[#allocation6 + $0x28] sm:$0xff]   ;;  %v310_v26 = vpack.c.bf16 %v280_v20, %v278_v19  ;;  %v313_v27 = vpack.c.bf16 %v285_v22, %v283_v21  ;;  %v282_v28 = vld [vmem:[%s1369_s13 + $0x20] sm:$0xff] }
  0x59   : > { %979 = vmatpush3.bf16.msra.mxu1 %v1090_v23  ;;  %v284_v29 = vld [vmem:[%s1369_s13 + $0x30] sm:$0xff]  ;;  %v287_v30 = vld [vmem:[%s1369_s13 + $0x48] sm:$0xff]  ;;  %v289_v31 = vld [vmem:[%s1369_s13 + $0x58] sm:$0xff] }
  0x5a   : > { %903 = vmatpush3.bf16.msra.mxu0 %v1079_v5  ;;  %980 = vmatprep.subr.bf16.mxu1 %v1091_v24  ;;  %v312_v32 = vpack.c.bf16 %v284_v29, %v282_v28  ;;  %v315_v33 = vpack.c.bf16 %v289_v31, %v287_v30  ;;  %v286_v34 = vld [vmem:[%s1369_s13 + $0x40] sm:$0xff]  ;;  %v288_v35 = vld [vmem:[%s1369_s13 + $0x50] sm:$0xff]  ;;  %v291_v36 = vld [vmem:[%s1369_s13 + $0x68] sm:$0xff] }
  0x5b   : > { %904 = vmatprep.subr.bf16.mxu0 %v1080_v6  ;;  %v293_v37 = vld [vmem:[%s1369_s13 + $0x78] sm:$0xff]  ;;  %v314_v38 = vpack.c.bf16 %v288_v35, %v286_v34  ;;  %v290_v40 = vld [vmem:[%s1369_s13 + $0x60] sm:$0xff]  ;;  %v292_v41 = vld [vmem:[%s1369_s13 + $0x70] sm:$0xff] }
  0x5c   : > { %v317_v39 = vpack.c.bf16 %v293_v37, %v291_v36  ;;  %v295_v42 = vld [vmem:[%s1369_s13 + $0x88] sm:$0xff]  ;;  %v297_v43 = vld [vmem:[%s1369_s13 + $0x98] sm:$0xff]  ;;  %v316_v44 = vpack.c.bf16 %v292_v41, %v290_v40  ;;  %v294_v46 = vld [vmem:[%s1369_s13 + $0x80] sm:$0xff] }
  0x5d   : > { %981 = vmatpush3.bf16.msra.mxu1 %v1091_v24  ;;  %v319_v45 = vpack.c.bf16 %v297_v43, %v295_v42  ;;  %v296_v47 = vld [vmem:[%s1369_s13 + $0x90] sm:$0xff]  ;;  %v299_v48 = vld [vmem:[%s1369_s13 + $0xa8] sm:$0xff]  ;;  %v301_v49 = vld [vmem:[%s1369_s13 + $0xb8] sm:$0xff] }
  0x5e   : > { %905 = vmatpush3.bf16.msra.mxu0 %v1081_v7  ;;  %982 = vmatprep.subr.bf16.mxu1 %v1092_v25  ;;  %v318_v50 = vpack.c.bf16 %v296_v47, %v294_v46  ;;  %v321_v51 = vpack.c.bf16 %v301_v49, %v299_v48  ;;  %v298_v52 = vld [vmem:[%s1369_s13 + $0xa0] sm:$0xff]  ;;  %v300_v53 = vld [vmem:[%s1369_s13 + $0xb0] sm:$0xff]  ;;  %v303_v54 = vld [vmem:[%s1369_s13 + $0xc8] sm:$0xff] }
  0x5f   : > { %906 = vmatprep.subr.bf16.mxu0 %v1082_v8  ;;  %v305_v55 = vld [vmem:[%s1369_s13 + $0xd8] sm:$0xff]  ;;  %v320_v56 = vpack.c.bf16 %v300_v53, %v298_v52  ;;  %v302_v58 = vld [vmem:[%s1369_s13 + $0xc0] sm:$0xff]  ;;  %v304_v59 = vld [vmem:[%s1369_s13 + $0xd0] sm:$0xff] }
  0x60   : > { %v323_v57 = vpack.c.bf16 %v305_v55, %v303_v54  ;;  %v307_v60 = vld [vmem:[%s1369_s13 + $0xe8] sm:$0xff]  ;;  %v309_v61 = vld [vmem:[%s1369_s13 + $0xf8] sm:$0xff]  ;;  %v322_v62 = vpack.c.bf16 %v304_v59, %v302_v58  ;;  %v306_v0 = vld [vmem:[%s1369_s13 + $0xe0] sm:$0xff] }
  0x61   : > { %983 = vmatpush3.bf16.msra.mxu1 %v1092_v25  ;;  %v325_v63 = vpack.c.bf16 %v309_v61, %v307_v60  ;;  %v308_v1 = vld [vmem:[%s1369_s13 + $0xf0] sm:$0xff]  ;;  %v1093_v3 = vld [vmem:[#allocation6 + $0x20] sm:$0xff]   ;;  %v1094_v4 = vld [vmem:[#allocation6 + $0x18] sm:$0xff]  }
  0x62   : > { %907 = vmatpush3.bf16.msra.mxu0 %v1083_v9  ;;  %v324_v2 = vpack.c.bf16 %v308_v1, %v306_v0  ;;  %984 = vmatprep.subr.bf16.mxu1 %v1093_v3  ;;  %v1095_v5 = vld [vmem:[#allocation6 + $0x10] sm:$0xff]   ;;  %v1096_v6 = vld [vmem:[#allocation6 + $0x8] sm:$0xff]   ;;  %v1097_v7 = vld [vmem:[#allocation6] sm:$0xff]  }
  0x63   : > { %908 = vmatprep.subr.bf16.mxu0 %v1084_v10  ;;  %v1414_v12 = vld [vmem:[%s1473_s2] ss:$0 sm:$0xff] }
  0x65   : > { %985 = vmatpush3.bf16.msra.mxu1 %v1093_v3 }
  0x66   : > { %909 = vmatpush3.bf16.msra.mxu0 %v1085_v14  ;;  %986 = vmatprep.subr.bf16.mxu1 %v1094_v4 }
  0x67   : > { %910 = vmatprep.subr.bf16.mxu0 %v1086_v15 }
  0x69   : > { %987 = vmatpush3.bf16.msra.mxu1 %v1094_v4 }
  0x6a   : > { %911 = vmatpush3.bf16.msra.mxu0 %v1087_v16  ;;  %988 = vmatprep.subr.bf16.mxu1 %v1095_v5 }
  0x6b   : > { %912 = vmatprep.subr.bf16.mxu0 %v1088_v17 }
  0x6d   : > { %989 = vmatpush3.bf16.msra.mxu1 %v1095_v5 }
  0x6e   : > { %913 = vmatpush3.bf16.msra.mxu0 %v1089_v18  ;;  %990 = vmatprep.subr.bf16.mxu1 %v1096_v6 }
  0x71   : > { %494 = vmatmul.mubr.bf16.vlgmr.msra.gmra.mxu0 %v310_v26  ;;  %991 = vmatpush3.bf16.msra.mxu1 %v1096_v6 }
  0x72   : > { %501 = vmatprep.mubr.bf16.mxu0 %v313_v27  ;;  %992 = vmatprep.subr.bf16.mxu1 %v1097_v7 }
  0x75   : > { %993 = vmatpush3.bf16.msra.mxu1 %v1097_v7 }
  0x79   : > { %502 = vmatmul.mubr.bf16.gmra.mxu0 %v312_v32 }
  0x7a   : > { %509 = vmatprep.mubr.bf16.mxu0 %v315_v33 }
  0x81   : > { %510 = vmatmul.mubr.bf16.gmra.mxu0 %v314_v38 }
  0x82   : > { %517 = vmatprep.mubr.bf16.mxu0 %v317_v39 }
  0x89   : > { %518 = vmatmul.mubr.bf16.gmra.mxu0 %v316_v44 }
  0x8a   : > { %525 = vmatprep.mubr.bf16.mxu0 %v319_v45 }
  0x91   : > { %526 = vmatmul.mubr.bf16.gmra.mxu0 %v318_v50 }
  0x92   : > { %533 = vmatprep.mubr.bf16.mxu0 %v321_v51 }
  0x99   : > { %534 = vmatmul.mubr.bf16.gmra.mxu0 %v320_v56 }
  0x9a   : > { %541 = vmatprep.mubr.bf16.mxu0 %v323_v57 }
  0xa1   : > { %542 = vmatmul.mubr.bf16.gmra.mxu0 %v322_v62 }
  0xa2   : > { %549 = vmatprep.mubr.bf16.mxu0 %v325_v63 }
  0xa9   : > { %550 = vmatmul.mubr.bf16.gmra.mxu0 %v324_v2 }
 0x131   : > { %v914_v8 = vpop.f32.mrf.mxu0 }
 0x133   : > { %v915_v9 = vpop.f32.mrf.mxu0 }
 0x134   : > { %v916_v10 = vadd.f32 %v915_v9, %v914_v8 }
 0x135   : > { %v917_v11 = vpop.f32.mrf.mxu0 }
 0x136   : > { %v496_v15 = vadd.f32 %v916_v10, %v1414_v12 }
 0x137   : > { %v918_v13 = vpop.f32.mrf.mxu0 }
 0x138   : > { %v919_v14 = vadd.f32 %v918_v13, %v917_v11  ;;  %v558_v20 = vmax.f32 %v496_v15, 0.0 }
 0x139   : > { %v920_v16 = vpop.f32.mrf.mxu0 }
 0x13a   : > { %v499_v17 = vadd.f32 %v919_v14, %v1414_v12 }
 0x13b   : > { %v921_v18 = vpop.f32.mrf.mxu0 }
 0x13c   : > { %v922_v19 = vadd.f32 %v921_v18, %v920_v16  ;;  %v559_v21 = vmax.f32 %v499_v17, 0.0 }
 0x13d   : > { %v923_v22 = vpop.f32.mrf.mxu0 }
 0x13e   : > { %v574_v23 = vpack.c.bf16 %v559_v21, %v558_v20  ;;  %v504_v25 = vadd.f32 %v922_v19, %v1414_v12 }
 0x13f   : > { %v924_v24 = vpop.f32.mrf.mxu0 }
 0x140   : > { %v925_v26 = vadd.f32 %v924_v24, %v923_v22  ;;  %994 = vmatprep.mubr.bf16.mxu1 %v574_v23  ;;  %v560_v30 = vmax.f32 %v504_v25, 0.0 }
 0x141   : > { %v926_v27 = vpop.f32.mrf.mxu0 }
 0x142   : > { %v507_v28 = vadd.f32 %v925_v26, %v1414_v12 }
 0x143   : > { %v927_v29 = vpop.f32.mrf.mxu0 }
 0x144   : > { %v561_v31 = vmax.f32 %v507_v28, 0.0  ;;  %v928_v32 = vadd.f32 %v927_v29, %v926_v27 }
 0x145   : > { %v929_v33 = vpop.f32.mrf.mxu0 }
 0x146   : > { %v575_v34 = vpack.c.bf16 %v561_v31, %v560_v30  ;;  %v512_v36 = vadd.f32 %v928_v32, %v1414_v12 }
 0x147   : > { %v930_v35 = vpop.f32.mrf.mxu0 }
 0x148   : > { %v931_v37 = vadd.f32 %v930_v35, %v929_v33  ;;  %995 = vmatmul.mubr.bf16.vlgmr.msra.gmra.mxu1 %v575_v34  ;;  %v562_v41 = vmax.f32 %v512_v36, 0.0  ;;  %v885_v34 = vld [vmem:[%s1475_s4] ss:$0 sm:$0xff] }
 0x149   : > { %v932_v38 = vpop.f32.mrf.mxu0 }
 0x14a   : > { %v515_v39 = vadd.f32 %v931_v37, %v1414_v12 }
 0x14b   : > { %v933_v40 = vpop.f32.mrf.mxu0 }
 0x14c   : > { %v563_v42 = vmax.f32 %v515_v39, 0.0  ;;  %v934_v43 = vadd.f32 %v933_v40, %v932_v38 }
 0x14d   : > { %v935_v44 = vpop.f32.mrf.mxu0 }
 0x14e   : > { %v576_v45 = vpack.c.bf16 %v563_v42, %v562_v41  ;;  %v520_v47 = vadd.f32 %v934_v43, %v1414_v12 }
 0x14f   : > { %v936_v46 = vpop.f32.mrf.mxu0 }
 0x150   : > { %v937_v48 = vadd.f32 %v936_v46, %v935_v44  ;;  %998 = vmatprep.mubr.bf16.mxu1 %v576_v45  ;;  %v564_v52 = vmax.f32 %v520_v47, 0.0 }
 0x151   : > { %v938_v49 = vpop.f32.mrf.mxu0 }
 0x152   : > { %v523_v50 = vadd.f32 %v937_v48, %v1414_v12 }
 0x153   : > { %v939_v51 = vpop.f32.mrf.mxu0 }
 0x154   : > { %v565_v53 = vmax.f32 %v523_v50, 0.0  ;;  %v940_v54 = vadd.f32 %v939_v51, %v938_v49 }
 0x155   : > { %v941_v55 = vpop.f32.mrf.mxu0 }
 0x156   : > { %v577_v56 = vpack.c.bf16 %v565_v53, %v564_v52  ;;  %v528_v58 = vadd.f32 %v940_v54, %v1414_v12 }
 0x157   : > { %v942_v57 = vpop.f32.mrf.mxu0 }
 0x158   : > { %v943_v59 = vadd.f32 %v942_v57, %v941_v55  ;;  %999 = vmatmul.mubr.bf16.gmra.mxu1 %v577_v56  ;;  %v566_v63 = vmax.f32 %v528_v58, 0.0 }
 0x159   : > { %v944_v60 = vpop.f32.mrf.mxu0 }
 0x15a   : > { %v531_v61 = vadd.f32 %v943_v59, %v1414_v12 }
 0x15b   : > { %v945_v62 = vpop.f32.mrf.mxu0 }
 0x15c   : > { %v567_v0 = vmax.f32 %v531_v61, 0.0  ;;  %v946_v1 = vadd.f32 %v945_v62, %v944_v60 }
 0x15d   : > { %v947_v2 = vpop.f32.mrf.mxu0 }
 0x15e   : > { %v578_v3 = vpack.c.bf16 %v567_v0, %v566_v63  ;;  %v536_v5 = vadd.f32 %v946_v1, %v1414_v12 }
 0x15f   : > { %v948_v4 = vpop.f32.mrf.mxu0 }
 0x160   : > { %v949_v6 = vadd.f32 %v948_v4, %v947_v2  ;;  %1002 = vmatprep.mubr.bf16.mxu1 %v578_v3  ;;  %v568_v10 = vmax.f32 %v536_v5, 0.0 }
 0x161   : > { %v950_v7 = vpop.f32.mrf.mxu0 }
 0x162   : > { %v539_v8 = vadd.f32 %v949_v6, %v1414_v12 }
 0x163   : > { %v951_v9 = vpop.f32.mrf.mxu0 }
 0x164   : > { %v569_v11 = vmax.f32 %v539_v8, 0.0  ;;  %v952_v13 = vadd.f32 %v951_v9, %v950_v7 }
 0x165   : > { %v953_v14 = vpop.f32.mrf.mxu0 }
 0x166   : > { %v579_v15 = vpack.c.bf16 %v569_v11, %v568_v10  ;;  %v544_v17 = vadd.f32 %v952_v13, %v1414_v12 }
 0x167   : > { %v954_v16 = vpop.f32.mrf.mxu0 }
 0x168   : > { %v955_v18 = vadd.f32 %v954_v16, %v953_v14  ;;  %1003 = vmatmul.mubr.bf16.gmra.mxu1 %v579_v15  ;;  %v570_v22 = vmax.f32 %v544_v17, 0.0 }
 0x169   : > { %v956_v19 = vpop.f32.mrf.mxu0 }
 0x16a   : > { %v547_v20 = vadd.f32 %v955_v18, %v1414_v12 }
 0x16b   : > { %v957_v21 = vpop.f32.mrf.mxu0 }
 0x16c   : > { %v571_v23 = vmax.f32 %v547_v20, 0.0  ;;  %v958_v24 = vadd.f32 %v957_v21, %v956_v19 }
 0x16d   : > { %v959_v25 = vpop.f32.mrf.mxu0 }
 0x16e   : > { %v580_v26 = vpack.c.bf16 %v571_v23, %v570_v22  ;;  %v552_v28 = vadd.f32 %v958_v24, %v1414_v12 }
 0x16f   : > { %v960_v27 = vpop.f32.mrf.mxu0 }
 0x170   : > { %v961_v29 = vadd.f32 %v960_v27, %v959_v25  ;;  %1006 = vmatprep.mubr.bf16.mxu1 %v580_v26  ;;  %v572_v31 = vmax.f32 %v552_v28, 0.0 }
 0x172   : > { %v555_v30 = vadd.f32 %v961_v29, %v1414_v12 }
 0x174   : > { %v573_v32 = vmax.f32 %v555_v30, 0.0 }
 0x176   : > { %v581_v33 = vpack.c.bf16 %v573_v32, %v572_v31 }
 0x178   : > { %1007 = vmatmul.mubr.bf16.gmra.mxu1 %v581_v33 }
 0x208   : > { %v996_v12 = vpop.f32.mrf.mxu1 }
 0x209   : > { %v696_v35 = vadd.f32 %v996_v12, %v885_v34 }
 0x20a   : > { %v687_v36 = vpop.f32.mrf.mxu1 }
 0x20b   : > { %752 = vst [vmem:[%s1440_s16 + $0x10] sm:$0xff] %v696_v35  ;;  %v688_v37 = vadd.f32 %v885_v34, %v687_v36 }
 0x20c   : > { %v997_v38 = vpop.f32.mrf.mxu1 }
 0x20d   : > { %750 = vst [vmem:[%s1440_s16] sm:$0xff] %v688_v37  ;;  %v699_v39 = vadd.f32 %v997_v38, %v885_v34 }
 0x20e   : > { %v690_v40 = vpop.f32.mrf.mxu1 }
 0x20f   : > { %753 = vst [vmem:[%s1440_s16 + $0x18] sm:$0xff] %v699_v39  ;;  %v691_v41 = vadd.f32 %v885_v34, %v690_v40 }
 0x211   : > { %751 = vst [vmem:[%s1440_s16 + $0x8] sm:$0xff] %v691_v41 }
 0x218   : > { %v1000_v42 = vpop.f32.mrf.mxu1 }
 0x219   : > { %v712_v43 = vadd.f32 %v1000_v42, %v885_v34 }
 0x21a   : > { %v703_v44 = vpop.f32.mrf.mxu1 }
 0x21b   : > { %756 = vst [vmem:[%s1440_s16 + $0x30] sm:$0xff] %v712_v43  ;;  %v704_v45 = vadd.f32 %v885_v34, %v703_v44 }
 0x21c   : > { %v1001_v46 = vpop.f32.mrf.mxu1 }
 0x21d   : > { %754 = vst [vmem:[%s1440_s16 + $0x20] sm:$0xff] %v704_v45  ;;  %v715_v47 = vadd.f32 %v1001_v46, %v885_v34 }
 0x21e   : > { %v706_v48 = vpop.f32.mrf.mxu1 }
 0x21f   : > { %757 = vst [vmem:[%s1440_s16 + $0x38] sm:$0xff] %v715_v47  ;;  %v707_v49 = vadd.f32 %v885_v34, %v706_v48 }
 0x221   : > { %755 = vst [vmem:[%s1440_s16 + $0x28] sm:$0xff] %v707_v49 }
 0x228   : > { %v1004_v50 = vpop.f32.mrf.mxu1 }
 0x229   : > { %v728_v51 = vadd.f32 %v1004_v50, %v885_v34 }
 0x22a   : > { %v719_v52 = vpop.f32.mrf.mxu1 }
 0x22b   : > { %760 = vst [vmem:[%s1440_s16 + $0x50] sm:$0xff] %v728_v51  ;;  %v720_v53 = vadd.f32 %v885_v34, %v719_v52 }
 0x22c   : > { %v1005_v54 = vpop.f32.mrf.mxu1 }
 0x22d   : > { %758 = vst [vmem:[%s1440_s16 + $0x40] sm:$0xff] %v720_v53  ;;  %v731_v55 = vadd.f32 %v1005_v54, %v885_v34 }
 0x22e   : > { %v722_v56 = vpop.f32.mrf.mxu1 }
 0x22f   : > { %761 = vst [vmem:[%s1440_s16 + $0x58] sm:$0xff] %v731_v55  ;;  %v723_v57 = vadd.f32 %v885_v34, %v722_v56 }
 0x231   : > { %759 = vst [vmem:[%s1440_s16 + $0x48] sm:$0xff] %v723_v57 }
 0x238   : > { %v1008_v58 = vpop.f32.mrf.mxu1 }
 0x239   : > { %v744_v59 = vadd.f32 %v1008_v58, %v885_v34 }
 0x23a   : > { %v735_v60 = vpop.f32.mrf.mxu1 }
 0x23b   : > { %764 = vst [vmem:[%s1440_s16 + $0x70] sm:$0xff] %v744_v59  ;;  %v736_v61 = vadd.f32 %v885_v34, %v735_v60 }
 0x23c   : > { %v1009_v62 = vpop.f32.mrf.mxu1 }
 0x23d   : > { %762 = vst [vmem:[%s1440_s16 + $0x60] sm:$0xff] %v736_v61  ;;  %v747_v63 = vadd.f32 %v1009_v62, %v885_v34 }
 0x23e   : > { %v738_v0 = vpop.f32.mrf.mxu1 }
 0x23f   : > { %765 = vst [vmem:[%s1440_s16 + $0x78] sm:$0xff] %v747_v63  ;;  %v739_v1 = vadd.f32 %v885_v34, %v738_v0 }
 0x241   : > { %763 = vst [vmem:[%s1440_s16 + $0x68] sm:$0xff] %v739_v1 }
 0x242 PF: > { %s1489_s21 = smov %s1331_s18  ;;  %p16_p10 = scmp.ge.s32.totalorder %s1320_s14, 6  }
 0x243   : > { %s1490_s18 = smov %s1208_s19  ;;  %s1491_s19 = smov %s1212_s20 }
 0x244   : > { %s1492_s20 = smov %s1489_s21  ;;  %s1493_s21 = smov %s1320_s14 }
 0x245   :  { %18 = sbr.rel (!%p16_p10) target bundleno = 4 (0x4), region = 88 }
 0x24a   :  { %788 = vsyncpa [#allocation3], 1 }
 0x24b   :  { %790 = vsyncpa [#allocation3 + $0x1], 1 }
 0x24c   :  { %791 = vsyncpa [#allocation5], 1 }

</bundles_post_ra>
